<compile_context>
chip_gen: v7x
topology: tpu7x:2x2x1
jax: 0.10.0
libtpu: 0.0.40
codegen_flags: <defaults>
</compile_context>

<pallas_src>
import functools

import numpy as np
import jax
import jax.numpy as jnp
from jax import lax
from jax.experimental import pallas as pl
from jax.experimental.pallas import tpu as pltpu


def _sum2d(x):
    """Full reduction of a 2-D array keeping a (1, 1) shape (TPU-friendly)."""
    return jnp.sum(jnp.sum(x, axis=1, keepdims=True), axis=0, keepdims=True)


# ----------------------------------------------------------------------------
# Fused kernel: loss_labels + loss_cardinality + loss_curves
# ----------------------------------------------------------------------------
def _criterion_kernel(logits_ref, pred_ref, tgt_ref, idx_ref, out_ref, *,
                      batch, num_queries, n_points):
    f32 = jnp.float32
    logits = logits_ref[...]              # (C, N)
    C, N = logits.shape
    pred_t = pred_ref[...]                # (7, N)
    tgt = tgt_ref[...]                    # (Dt+1, M_pad)
    idx = idx_ref[...]                    # (M_pad, 1) int32
    P = n_points
    Dt = 3 + 2 * P
    M_pad = tgt.shape[1]

    label_row = tgt[0:1, :]               # (1, M_pad) class of each matched curve
    valid_row = tgt[Dt:Dt + 1, :]         # (1, M_pad) 1.0 for real (non-pad) rows

    # ---- in-kernel scatter + gather via a one-hot selection matrix (MXU) ----
    lane_n = lax.broadcasted_iota(jnp.int32, (M_pad, N), 1)
    sel = (lane_n == idx).astype(f32)                                     # (M_pad, N)
    tgt_cls = jnp.dot(label_row * valid_row, sel,
                      preferred_element_type=f32)                         # (1, N)
    mask = jnp.dot(valid_row, sel, preferred_element_type=f32)            # (1, N)
    # matched pred_curves rows, lane-dense: (7, M_pad) = pred_t (7,N) . sel^T
    pred_m = lax.dot_general(pred_t, sel, (((1,), (1,)), ((), ())),
                             preferred_element_type=f32)

    # ------------------------- labels / class error --------------------------
    m = jnp.max(logits, axis=0, keepdims=True)                            # (1, N)
    lse = m + jnp.log(jnp.sum(jnp.exp(logits - m), axis=0, keepdims=True))
    iota_c = lax.broadcasted_iota(jnp.int32, (C, N), 0).astype(f32)
    onehot = jnp.abs(iota_c - tgt_cls) < 0.5
    picked = jnp.sum(jnp.where(onehot, logits, 0.0), axis=0, keepdims=True)
    # empty_weight == ones in the reference -> plain mean NLL over all B*Q queries
    loss_ce = _sum2d(lse - picked) * (1.0 / N)

    # argmax over classes (first occurrence); reuses the row max `m`
    pred_cls = jnp.min(jnp.where(logits == m, iota_c, float(C)),
                       axis=0, keepdims=True)                             # (1, N)
    correct = jnp.where(jnp.abs(pred_cls - tgt_cls) < 0.5, mask, 0.0)
    n_matched = _sum2d(mask)
    class_err = 100.0 - 100.0 * _sum2d(correct) / jnp.maximum(n_matched, 1.0)

    # ------------------------------ cardinality -------------------------------
    nonzero = (pred_cls > 0.5).astype(f32)                                # (1, N)
    b_io = lax.broadcasted_iota(jnp.int32, (batch, N), 0)
    q_io = lax.broadcasted_iota(jnp.int32, (batch, N), 1)
    lo = b_io * num_queries
    bsel = ((q_io >= lo) & (q_io < lo + num_queries)).astype(f32)         # (B, N)
    card_pred = lax.dot_general(bsel, nonzero, (((1,), (1,)), ((), ())),
                                preferred_element_type=f32)               # (B, 1)
    tgt_len = lax.dot_general(bsel, mask, (((1,), (1,)), ((), ())),
                              preferred_element_type=f32)                 # (B, 1)
    card_err = _sum2d(jnp.abs(card_pred - tgt_len)) * (1.0 / batch)

    # -------------------------------- curves ----------------------------------
    rv = valid_row                                                        # (1, M_pad)
    lowers = pred_m[0:1, :]
    uppers = pred_m[1:2, :]
    a = pred_m[2:3, :]
    b = pred_m[3:4, :]
    c = pred_m[4:5, :]
    d = pred_m[5:6, :]
    e = pred_m[6:7, :]

    t_low = tgt[1:2, :]
    t_up = tgt[2:3, :]
    t_xs = tgt[3:3 + P, :]                                                # (P, M_pad)
    ys = tgt[3 + P:3 + 2 * P, :]                                          # (P, M_pad)

    valid = jnp.where(t_xs >= 0.0, rv, 0.0)                               # (P, M_pad)
    total_valid = _sum2d(valid)
    per_curve = jnp.sum(valid, axis=0, keepdims=True)                     # (1, M_pad)
    ratio = total_valid / jnp.maximum(per_curve, 1.0)
    w = jnp.where(per_curve > 0.0, jnp.sqrt(ratio), 0.0)
    max_w = jnp.max(w, axis=1, keepdims=True)
    w = w / jnp.maximum(max_w, 1e-12)                                     # guard max==0

    # exact division (no approx vrcp in the squared term); masked pts get dy=1
    dy = jnp.where(valid > 0.0, ys - b, 1.0)
    inv_dy = 1.0 / dy
    pred_xs = a * inv_dy * inv_dy + c * inv_dy + d + e * ys - b * e
    diff = jnp.where(valid > 0.0, jnp.abs(pred_xs - t_xs) * w, 0.0)

    nc = jnp.maximum(_sum2d(rv), 1.0)                 # num_curves, clamp(min=1)
    inv_nc = 1.0 / nc
    loss_lowers = _sum2d(jnp.abs(lowers - t_low) * rv) * inv_nc
    loss_uppers = _sum2d(jnp.abs(uppers - t_up) * rv) * inv_nc
    loss_polys = _sum2d(diff) * inv_nc

    # --------------------- packed, lane-dense scalar output -------------------
    lane = lax.broadcasted_iota(jnp.int32, (1, 128), 1)
    out_ref[...] = (jnp.where(lane == 0, loss_ce, 0.0)
                    + jnp.where(lane == 1, class_err, 0.0)
                    + jnp.where(lane == 2, card_err, 0.0)
                    + jnp.where(lane == 3, loss_lowers, 0.0)
                    + jnp.where(lane == 4, loss_uppers, 0.0)
                    + jnp.where(lane == 5, loss_polys, 0.0))


# ----------------------------------------------------------------------------
# Device-side wrapper (jit): layout plumbing + one pallas_call
# ----------------------------------------------------------------------------
@jax.jit
def _criterion_device(pred_logits, pred_curves, tgt_t, idx_col):
    B, Q, C = pred_logits.shape
    N = B * Q
    Dt1 = tgt_t.shape[0]
    P = (Dt1 - 1 - 3) // 2

    # TODO(synk): these transposes could fold into the pallas_call with
    # CompilerParams(allow_input_fusion=...); kept as tiny XLA ops for robustness.
    logits_t = jnp.transpose(pred_logits.astype(jnp.float32).reshape(N, C))       # (C, N)
    pred_t = jnp.transpose(
        pred_curves.astype(jnp.float32).reshape(N, pred_curves.shape[-1]))        # (7, N)

    vmem = pl.BlockSpec(memory_space=pltpu.MemorySpace.VMEM)
    out = pl.pallas_call(
        functools.partial(_criterion_kernel, batch=B, num_queries=Q, n_points=P),
        out_shape=jax.ShapeDtypeStruct((1, 128), jnp.float32),
        in_specs=[vmem, vmem, vmem, vmem],
        out_specs=vmem,
    )(logits_t, pred_t, tgt_t, idx_col)
    return out[0, :8]


# ----------------------------------------------------------------------------
# Python wrapper = SetCriterion.forward
# ----------------------------------------------------------------------------
def set_criterion_forward(pred_logits, pred_curves, targets, num_classes,
                          losses=("labels", "cardinality", "curves")):
    """pred_logits: (B, Q, C) f32; pred_curves: (B, Q, 7) f32;
       targets: list of np arrays (n_i, 3 + 2P) = [label, lower, upper, xs(P), ys(P)]."""
    B, Q, C = pred_logits.shape
    assert C == num_classes
    Dt = targets[0].shape[1]
    P = (Dt - 3) // 2

    # TODO(synk): HungarianMatcher is an injected module (not part of SetCriterion);
    # a deterministic identity matching (src j <-> tgt j) stands in for it here.
    indices = [(np.arange(t.shape[0], dtype=np.int32),
                np.arange(t.shape[0], dtype=np.int32)) for t in targets]

    M = int(sum(t.shape[0] for t in targets))
    # Static bucket -> no retrace/recompile when the number of GT curves changes.
    M_pad = max(128, ((M + 127) // 128) * 128)

    # Tiny host packing of the ragged target list; everything that scales with
    # B*Q (class scatter, pred gather) happens on device inside the kernel.
    tgt_t = np.zeros((Dt + 1, M_pad), np.float32)
    tgt_t[3:3 + P, :] = -1.0            # pad columns: xs invalid
    tgt_t[3 + P:3 + 2 * P, :] = 0.5     # pad columns: safe ys (masked anyway)
    idx_col = np.zeros((M_pad, 1), np.int32)
    if M > 0:
        flat_src = np.concatenate(
            [b * Q + np.asarray(src, np.int64) for b, (src, _) in enumerate(indices)])
        tgt_rows = np.concatenate(
            [np.asarray(t, np.float32)[np.asarray(j)]
             for t, (_, j) in zip(targets, indices)], axis=0)
        tgt_t[:Dt, :M] = tgt_rows.T
        tgt_t[Dt, :M] = 1.0             # valid-row flag
        idx_col[:M, 0] = flat_src.astype(np.int32)

    out = _criterion_device(jnp.asarray(pred_logits, jnp.float32),
                            jnp.asarray(pred_curves, jnp.float32),
                            jnp.asarray(tgt_t),
                            jnp.asarray(idx_col))

    result = {}
    if "labels" in losses:
        result["loss_ce"] = out[0]
        result["class_error"] = out[1]
    if "cardinality" in losses:
        result["cardinality_error"] = out[2]
    if "curves" in losses:
        result["loss_lowers"] = out[3]
        result["loss_uppers"] = out[4]
        result["loss_curves"] = out[5]
    # TODO(synk): 'aux_outputs' branch omitted (no aux decoder layers in this setup);
    # distributed all_reduce of num_curves omitted (single-process).
    return result, indices


if __name__ == "__main__":
    B, Q, num_classes, P = 2, 8, 4, 4
    key = jax.random.PRNGKey(0)
    k1, k2, k3 = jax.random.split(key, 3)

    pred_logits = jax.random.normal(k1, (B, Q, num_classes), jnp.float32)
    pred_curves = 0.5 * jax.random.normal(k2, (B, Q, 7), jnp.float32)

    # Targets: per-image array (n_i, 3 + 2P) = [label, lower, upper, xs(P), ys(P)]
    n_per_image = [2, 3]
    targets = []
    tkeys = jax.random.split(k3, B)
    for bidx, n in enumerate(n_per_image):
        ka, kb, kc, kd = jax.random.split(tkeys[bidx], 4)
        labels = jax.random.randint(ka, (n, 1), 1, num_classes).astype(jnp.float32)
        low_up = jax.random.uniform(kb, (n, 2), jnp.float32, 0.0, 1.0)
        xs = jax.random.uniform(kc, (n, P), jnp.float32, 0.0, 1.0)
        ys = jax.random.uniform(kd, (n, P), jnp.float32, 0.1, 0.9)
        # np.array(...) makes a writable host copy
        t = np.array(jnp.concatenate([labels, low_up, xs, ys], axis=1), dtype=np.float32)
        if bidx == 0:
            t[0, 3] = -1.0   # one invalid x point exercises the valid-mask path
        targets.append(t)

    losses, indices = set_criterion_forward(pred_logits, pred_curves, targets, num_classes)
    losses = jax.tree_util.tree_map(jax.block_until_ready, losses)
    print("KERNEL_OK")
</pallas_src>

<mosaic_0001>
module attributes {stable_mosaic.version = 11 : i64} {
  func.func @_criterion_kernel(%arg0: memref<4x16xf32, #tpu.memory_space<vmem>>, %arg1: memref<7x16xf32, #tpu.memory_space<vmem>>, %arg2: memref<12x128xf32, #tpu.memory_space<vmem>>, %arg3: memref<128x1xi32, #tpu.memory_space<vmem>>, %arg4: memref<1x128xf32, #tpu.memory_space<vmem>>) attributes {dimension_semantics = [], scalar_prefetch = 0 : i64, scratch_operands = 0 : i64, tpu.core_type = #tpu.core_type<tc>} {
    %c0 = arith.constant 0 : index
    %c0_0 = arith.constant 0 : index
    %0 = vector.load %arg0[%c0, %c0_0] : memref<4x16xf32, #tpu.memory_space<vmem>>, vector<4x16xf32>
    %c0_1 = arith.constant 0 : index
    %c0_2 = arith.constant 0 : index
    %1 = vector.load %arg1[%c0_1, %c0_2] : memref<7x16xf32, #tpu.memory_space<vmem>>, vector<7x16xf32>
    %c0_3 = arith.constant 0 : index
    %c0_4 = arith.constant 0 : index
    %2 = vector.load %arg2[%c0_3, %c0_4] : memref<12x128xf32, #tpu.memory_space<vmem>>, vector<12x128xf32>
    %c0_5 = arith.constant 0 : index
    %c0_6 = arith.constant 0 : index
    %3 = vector.load %arg3[%c0_5, %c0_6] : memref<128x1xi32, #tpu.memory_space<vmem>>, vector<128x1xi32>
    %4 = vector.extract_strided_slice %2 {offsets = [0, 0], sizes = [1, 128], strides = [1, 1]} : vector<12x128xf32> to vector<1x128xf32>
    %5 = vector.extract_strided_slice %2 {offsets = [11, 0], sizes = [1, 128], strides = [1, 1]} : vector<12x128xf32> to vector<1x128xf32>
    %6 = tpu.iota {dimensions = array<i32: 1>} : vector<128x16xi32>
    %7 = vector.broadcast %3 : vector<128x1xi32> to vector<128x16xi32>
    %8 = arith.cmpi eq, %6, %7 : vector<128x16xi32>
    %9 = arith.extui %8 : vector<128x16xi1> to vector<128x16xi32>
    %10 = arith.sitofp %9 : vector<128x16xi32> to vector<128x16xf32>
    %11 = arith.mulf %4, %5 : vector<1x128xf32>
    %cst = arith.constant dense<0.000000e+00> : vector<1x16xf32>
    %12 = tpu.matmul %11, %10, %cst {dimension_numbers = #tpu.dot_dimension_numbers<[1], [0], [0], [1], [0, 0, 1, 1], [], []>} : vector<1x128xf32>, vector<128x16xf32>, vector<1x16xf32> -> vector<1x16xf32>
    %cst_7 = arith.constant dense<0.000000e+00> : vector<1x16xf32>
    %13 = tpu.matmul %5, %10, %cst_7 {dimension_numbers = #tpu.dot_dimension_numbers<[1], [0], [0], [1], [0, 0, 1, 1], [], []>} : vector<1x128xf32>, vector<128x16xf32>, vector<1x16xf32> -> vector<1x16xf32>
    %cst_8 = arith.constant dense<0.000000e+00> : vector<7x128xf32>
    %14 = tpu.matmul %1, %10, %cst_8 {dimension_numbers = #tpu.dot_dimension_numbers<[1], [1], [0], [0], [0, 0, 1, 0], [], []>} : vector<7x16xf32>, vector<128x16xf32>, vector<7x128xf32> -> vector<7x128xf32>
    %cst_9 = arith.constant dense<0xFF800000> : vector<16xf32>
    %15 = vector.multi_reduction <maximumf>, %0, %cst_9 [0] : vector<4x16xf32> to vector<16xf32>
    %16 = vector.shape_cast %15 : vector<16xf32> to vector<1x16xf32>
    %17 = vector.broadcast %16 : vector<1x16xf32> to vector<4x16xf32>
    %18 = arith.subf %0, %17 : vector<4x16xf32>
    %19 = math.exp %18 : vector<4x16xf32>
    %cst_10 = arith.constant dense<0.000000e+00> : vector<16xf32>
    %20 = vector.multi_reduction <add>, %19, %cst_10 [0] : vector<4x16xf32> to vector<16xf32>
    %21 = vector.shape_cast %20 : vector<16xf32> to vector<1x16xf32>
    %22 = math.log %21 : vector<1x16xf32>
    %23 = arith.addf %16, %22 : vector<1x16xf32>
    %24 = tpu.iota {dimensions = array<i32: 0>} : vector<4x16xi32>
    %25 = arith.sitofp %24 : vector<4x16xi32> to vector<4x16xf32>
    %26 = vector.broadcast %12 : vector<1x16xf32> to vector<4x16xf32>
    %27 = arith.subf %25, %26 : vector<4x16xf32>
    %28 = math.absf %27 : vector<4x16xf32>
    %cst_11 = arith.constant 5.000000e-01 : f32
    %29 = vector.broadcast %cst_11 : f32 to vector<4x16xf32>
    %30 = arith.cmpf olt, %28, %29 : vector<4x16xf32>
    %cst_12 = arith.constant 0.000000e+00 : f32
    %31 = vector.broadcast %cst_12 : f32 to vector<4x16xf32>
    %32 = arith.select %30, %0, %31 : vector<4x16xi1>, vector<4x16xf32>
    %cst_13 = arith.constant dense<0.000000e+00> : vector<16xf32>
    %33 = vector.multi_reduction <add>, %32, %cst_13 [0] : vector<4x16xf32> to vector<16xf32>
    %34 = vector.shape_cast %33 : vector<16xf32> to vector<1x16xf32>
    %35 = arith.subf %23, %34 : vector<1x16xf32>
    %cst_14 = arith.constant dense<0.000000e+00> : vector<1xf32>
    %36 = vector.multi_reduction <add>, %35, %cst_14 [1] : vector<1x16xf32> to vector<1xf32>
    %37 = vector.shape_cast %36 : vector<1xf32> to vector<1x1xf32>
    %cst_15 = arith.constant dense<0.000000e+00> : vector<1xf32>
    %38 = vector.multi_reduction <add>, %37, %cst_15 [0] : vector<1x1xf32> to vector<1xf32>
    %39 = vector.shape_cast %38 : vector<1xf32> to vector<1x1xf32>
    %cst_16 = arith.constant 6.250000e-02 : f32
    %40 = vector.broadcast %cst_16 : f32 to vector<1x1xf32>
    %41 = arith.mulf %39, %40 : vector<1x1xf32>
    %42 = vector.broadcast %16 : vector<1x16xf32> to vector<4x16xf32>
    %43 = arith.cmpf oeq, %0, %42 : vector<4x16xf32>
    %cst_17 = arith.constant 4.000000e+00 : f32
    %44 = vector.broadcast %cst_17 : f32 to vector<4x16xf32>
    %45 = arith.select %43, %25, %44 : vector<4x16xi1>, vector<4x16xf32>
    %cst_18 = arith.constant dense<0x7F800000> : vector<16xf32>
    %46 = vector.multi_reduction <minimumf>, %45, %cst_18 [0] : vector<4x16xf32> to vector<16xf32>
    %47 = vector.shape_cast %46 : vector<16xf32> to vector<1x16xf32>
    %48 = arith.subf %47, %12 : vector<1x16xf32>
    %49 = math.absf %48 : vector<1x16xf32>
    %cst_19 = arith.constant 5.000000e-01 : f32
    %50 = vector.broadcast %cst_19 : f32 to vector<1x16xf32>
    %51 = arith.cmpf olt, %49, %50 : vector<1x16xf32>
    %cst_20 = arith.constant 0.000000e+00 : f32
    %52 = vector.broadcast %cst_20 : f32 to vector<1x16xf32>
    %53 = arith.select %51, %13, %52 : vector<1x16xi1>, vector<1x16xf32>
    %cst_21 = arith.constant dense<0.000000e+00> : vector<1xf32>
    %54 = vector.multi_reduction <add>, %13, %cst_21 [1] : vector<1x16xf32> to vector<1xf32>
    %55 = vector.shape_cast %54 : vector<1xf32> to vector<1x1xf32>
    %cst_22 = arith.constant dense<0.000000e+00> : vector<1xf32>
    %56 = vector.multi_reduction <add>, %55, %cst_22 [0] : vector<1x1xf32> to vector<1xf32>
    %57 = vector.shape_cast %56 : vector<1xf32> to vector<1x1xf32>
    %cst_23 = arith.constant dense<0.000000e+00> : vector<1xf32>
    %58 = vector.multi_reduction <add>, %53, %cst_23 [1] : vector<1x16xf32> to vector<1xf32>
    %59 = vector.shape_cast %58 : vector<1xf32> to vector<1x1xf32>
    %cst_24 = arith.constant dense<0.000000e+00> : vector<1xf32>
    %60 = vector.multi_reduction <add>, %59, %cst_24 [0] : vector<1x1xf32> to vector<1xf32>
    %61 = vector.shape_cast %60 : vector<1xf32> to vector<1x1xf32>
    %cst_25 = arith.constant 1.000000e+02 : f32
    %62 = vector.broadcast %cst_25 : f32 to vector<1x1xf32>
    %63 = arith.mulf %62, %61 : vector<1x1xf32>
    %cst_26 = arith.constant 1.000000e+00 : f32
    %64 = vector.broadcast %cst_26 : f32 to vector<1x1xf32>
    %65 = arith.maximumf %57, %64 : vector<1x1xf32>
    %66 = arith.divf %63, %65 : vector<1x1xf32>
    %cst_27 = arith.constant 1.000000e+02 : f32
    %67 = vector.broadcast %cst_27 : f32 to vector<1x1xf32>
    %68 = arith.subf %67, %66 : vector<1x1xf32>
    %cst_28 = arith.constant 5.000000e-01 : f32
    %69 = vector.broadcast %cst_28 : f32 to vector<1x16xf32>
    %70 = arith.cmpf ogt, %47, %69 : vector<1x16xf32>
    %71 = arith.extui %70 : vector<1x16xi1> to vector<1x16xi32>
    %72 = arith.sitofp %71 : vector<1x16xi32> to vector<1x16xf32>
    %73 = tpu.iota {dimensions = array<i32: 0>} : vector<2x16xi32>
    %74 = tpu.iota {dimensions = array<i32: 1>} : vector<2x16xi32>
    %c8_i32 = arith.constant 8 : i32
    %75 = vector.broadcast %c8_i32 : i32 to vector<2x16xi32>
    %76 = arith.muli %73, %75 : vector<2x16xi32>
    %77 = arith.cmpi sge, %74, %76 : vector<2x16xi32>
    %c8_i32_29 = arith.constant 8 : i32
    %78 = vector.broadcast %c8_i32_29 : i32 to vector<2x16xi32>
    %79 = arith.addi %76, %78 : vector<2x16xi32>
    %80 = arith.cmpi slt, %74, %79 : vector<2x16xi32>
    %81 = arith.andi %77, %80 : vector<2x16xi1>
    %82 = arith.extui %81 : vector<2x16xi1> to vector<2x16xi32>
    %83 = arith.sitofp %82 : vector<2x16xi32> to vector<2x16xf32>
    %cst_30 = arith.constant dense<0.000000e+00> : vector<2x1xf32>
    %84 = tpu.matmul %83, %72, %cst_30 {dimension_numbers = #tpu.dot_dimension_numbers<[1], [1], [0], [0], [0, 0, 1, 0], [], []>} : vector<2x16xf32>, vector<1x16xf32>, vector<2x1xf32> -> vector<2x1xf32>
    %cst_31 = arith.constant dense<0.000000e+00> : vector<2x1xf32>
    %85 = tpu.matmul %83, %13, %cst_31 {dimension_numbers = #tpu.dot_dimension_numbers<[1], [1], [0], [0], [0, 0, 1, 0], [], []>} : vector<2x16xf32>, vector<1x16xf32>, vector<2x1xf32> -> vector<2x1xf32>
    %86 = arith.subf %84, %85 : vector<2x1xf32>
    %87 = math.absf %86 : vector<2x1xf32>
    %cst_32 = arith.constant dense<0.000000e+00> : vector<2xf32>
    %88 = vector.multi_reduction <add>, %87, %cst_32 [1] : vector<2x1xf32> to vector<2xf32>
    %89 = vector.shape_cast %88 : vector<2xf32> to vector<2x1xf32>
    %cst_33 = arith.constant dense<0.000000e+00> : vector<1xf32>
    %90 = vector.multi_reduction <add>, %89, %cst_33 [0] : vector<2x1xf32> to vector<1xf32>
    %91 = vector.shape_cast %90 : vector<1xf32> to vector<1x1xf32>
    %cst_34 = arith.constant 5.000000e-01 : f32
    %92 = vector.broadcast %cst_34 : f32 to vector<1x1xf32>
    %93 = arith.mulf %91, %92 : vector<1x1xf32>
    %94 = vector.extract_strided_slice %14 {offsets = [0, 0], sizes = [1, 128], strides = [1, 1]} : vector<7x128xf32> to vector<1x128xf32>
    %95 = vector.extract_strided_slice %14 {offsets = [1, 0], sizes = [1, 128], strides = [1, 1]} : vector<7x128xf32> to vector<1x128xf32>
    %96 = vector.extract_strided_slice %14 {offsets = [2, 0], sizes = [1, 128], strides = [1, 1]} : vector<7x128xf32> to vector<1x128xf32>
    %97 = vector.extract_strided_slice %14 {offsets = [3, 0], sizes = [1, 128], strides = [1, 1]} : vector<7x128xf32> to vector<1x128xf32>
    %98 = vector.extract_strided_slice %14 {offsets = [4, 0], sizes = [1, 128], strides = [1, 1]} : vector<7x128xf32> to vector<1x128xf32>
    %99 = vector.extract_strided_slice %14 {offsets = [5, 0], sizes = [1, 128], strides = [1, 1]} : vector<7x128xf32> to vector<1x128xf32>
    %100 = vector.extract_strided_slice %14 {offsets = [6, 0], sizes = [1, 128], strides = [1, 1]} : vector<7x128xf32> to vector<1x128xf32>
    %101 = vector.extract_strided_slice %2 {offsets = [1, 0], sizes = [1, 128], strides = [1, 1]} : vector<12x128xf32> to vector<1x128xf32>
    %102 = vector.extract_strided_slice %2 {offsets = [2, 0], sizes = [1, 128], strides = [1, 1]} : vector<12x128xf32> to vector<1x128xf32>
    %103 = vector.extract_strided_slice %2 {offsets = [3, 0], sizes = [4, 128], strides = [1, 1]} : vector<12x128xf32> to vector<4x128xf32>
    %104 = vector.extract_strided_slice %2 {offsets = [7, 0], sizes = [4, 128], strides = [1, 1]} : vector<12x128xf32> to vector<4x128xf32>
    %cst_35 = arith.constant 0.000000e+00 : f32
    %105 = vector.broadcast %cst_35 : f32 to vector<4x128xf32>
    %106 = arith.cmpf oge, %103, %105 : vector<4x128xf32>
    %cst_36 = arith.constant 0.000000e+00 : f32
    %107 = vector.shape_cast %5 : vector<1x128xf32> to vector<1x128xf32>
    %108 = vector.broadcast %107 : vector<1x128xf32> to vector<4x128xf32>
    %109 = vector.broadcast %cst_36 : f32 to vector<4x128xf32>
    %110 = arith.select %106, %108, %109 : vector<4x128xi1>, vector<4x128xf32>
    %cst_37 = arith.constant dense<0.000000e+00> : vector<4xf32>
    %111 = vector.multi_reduction <add>, %110, %cst_37 [1] : vector<4x128xf32> to vector<4xf32>
    %112 = vector.shape_cast %111 : vector<4xf32> to vector<4x1xf32>
    %cst_38 = arith.constant dense<0.000000e+00> : vector<1xf32>
    %113 = vector.multi_reduction <add>, %112, %cst_38 [0] : vector<4x1xf32> to vector<1xf32>
    %114 = vector.shape_cast %113 : vector<1xf32> to vector<1x1xf32>
    %cst_39 = arith.constant dense<0.000000e+00> : vector<128xf32>
    %115 = vector.multi_reduction <add>, %110, %cst_39 [0] : vector<4x128xf32> to vector<128xf32>
    %116 = vector.shape_cast %115 : vector<128xf32> to vector<1x128xf32>
    %cst_40 = arith.constant 1.000000e+00 : f32
    %117 = vector.broadcast %cst_40 : f32 to vector<1x128xf32>
    %118 = arith.maximumf %116, %117 : vector<1x128xf32>
    %119 = vector.broadcast %114 : vector<1x1xf32> to vector<1x128xf32>
    %120 = arith.divf %119, %118 : vector<1x128xf32>
    %cst_41 = arith.constant 0.000000e+00 : f32
    %121 = vector.broadcast %cst_41 : f32 to vector<1x128xf32>
    %122 = arith.cmpf ogt, %116, %121 : vector<1x128xf32>
    %123 = math.sqrt %120 : vector<1x128xf32>
    %cst_42 = arith.constant 0.000000e+00 : f32
    %124 = vector.broadcast %cst_42 : f32 to vector<1x128xf32>
    %125 = arith.select %122, %123, %124 : vector<1x128xi1>, vector<1x128xf32>
    %cst_43 = arith.constant dense<0xFF800000> : vector<1xf32>
    %126 = vector.multi_reduction <maximumf>, %125, %cst_43 [1] : vector<1x128xf32> to vector<1xf32>
    %127 = vector.shape_cast %126 : vector<1xf32> to vector<1x1xf32>
    %cst_44 = arith.constant 9.99999996E-13 : f32
    %128 = vector.broadcast %cst_44 : f32 to vector<1x1xf32>
    %129 = arith.maximumf %127, %128 : vector<1x1xf32>
    %130 = vector.broadcast %129 : vector<1x1xf32> to vector<1x128xf32>
    %131 = arith.divf %125, %130 : vector<1x128xf32>
    %cst_45 = arith.constant 0.000000e+00 : f32
    %132 = vector.broadcast %cst_45 : f32 to vector<4x128xf32>
    %133 = arith.cmpf ogt, %110, %132 : vector<4x128xf32>
    %134 = vector.broadcast %97 : vector<1x128xf32> to vector<4x128xf32>
    %135 = arith.subf %104, %134 : vector<4x128xf32>
    %cst_46 = arith.constant 1.000000e+00 : f32
    %136 = vector.broadcast %cst_46 : f32 to vector<4x128xf32>
    %137 = arith.select %133, %135, %136 : vector<4x128xi1>, vector<4x128xf32>
    %cst_47 = arith.constant 1.000000e+00 : f32
    %138 = vector.broadcast %cst_47 : f32 to vector<4x128xf32>
    %139 = arith.divf %138, %137 : vector<4x128xf32>
    %140 = vector.broadcast %96 : vector<1x128xf32> to vector<4x128xf32>
    %141 = arith.mulf %140, %139 : vector<4x128xf32>
    %142 = arith.mulf %141, %139 : vector<4x128xf32>
    %143 = vector.broadcast %98 : vector<1x128xf32> to vector<4x128xf32>
    %144 = arith.mulf %143, %139 : vector<4x128xf32>
    %145 = arith.addf %142, %144 : vector<4x128xf32>
    %146 = vector.broadcast %99 : vector<1x128xf32> to vector<4x128xf32>
    %147 = arith.addf %145, %146 : vector<4x128xf32>
    %148 = vector.broadcast %100 : vector<1x128xf32> to vector<4x128xf32>
    %149 = arith.mulf %148, %104 : vector<4x128xf32>
    %150 = arith.addf %147, %149 : vector<4x128xf32>
    %151 = arith.mulf %97, %100 : vector<1x128xf32>
    %152 = vector.broadcast %151 : vector<1x128xf32> to vector<4x128xf32>
    %153 = arith.subf %150, %152 : vector<4x128xf32>
    %cst_48 = arith.constant 0.000000e+00 : f32
    %154 = vector.broadcast %cst_48 : f32 to vector<4x128xf32>
    %155 = arith.cmpf ogt, %110, %154 : vector<4x128xf32>
    %156 = arith.subf %153, %103 : vector<4x128xf32>
    %157 = math.absf %156 : vector<4x128xf32>
    %158 = vector.broadcast %131 : vector<1x128xf32> to vector<4x128xf32>
    %159 = arith.mulf %157, %158 : vector<4x128xf32>
    %cst_49 = arith.constant 0.000000e+00 : f32
    %160 = vector.broadcast %cst_49 : f32 to vector<4x128xf32>
    %161 = arith.select %155, %159, %160 : vector<4x128xi1>, vector<4x128xf32>
    %cst_50 = arith.constant dense<0.000000e+00> : vector<1xf32>
    %162 = vector.multi_reduction <add>, %5, %cst_50 [1] : vector<1x128xf32> to vector<1xf32>
    %163 = vector.shape_cast %162 : vector<1xf32> to vector<1x1xf32>
    %cst_51 = arith.constant dense<0.000000e+00> : vector<1xf32>
    %164 = vector.multi_reduction <add>, %163, %cst_51 [0] : vector<1x1xf32> to vector<1xf32>
    %165 = vector.shape_cast %164 : vector<1xf32> to vector<1x1xf32>
    %cst_52 = arith.constant 1.000000e+00 : f32
    %166 = vector.broadcast %cst_52 : f32 to vector<1x1xf32>
    %167 = arith.maximumf %165, %166 : vector<1x1xf32>
    %cst_53 = arith.constant 1.000000e+00 : f32
    %168 = vector.broadcast %cst_53 : f32 to vector<1x1xf32>
    %169 = arith.divf %168, %167 : vector<1x1xf32>
    %170 = arith.subf %94, %101 : vector<1x128xf32>
    %171 = math.absf %170 : vector<1x128xf32>
    %172 = arith.mulf %171, %5 : vector<1x128xf32>
    %cst_54 = arith.constant dense<0.000000e+00> : vector<1xf32>
    %173 = vector.multi_reduction <add>, %172, %cst_54 [1] : vector<1x128xf32> to vector<1xf32>
    %174 = vector.shape_cast %173 : vector<1xf32> to vector<1x1xf32>
    %cst_55 = arith.constant dense<0.000000e+00> : vector<1xf32>
    %175 = vector.multi_reduction <add>, %174, %cst_55 [0] : vector<1x1xf32> to vector<1xf32>
    %176 = vector.shape_cast %175 : vector<1xf32> to vector<1x1xf32>
    %177 = arith.mulf %176, %169 : vector<1x1xf32>
    %178 = arith.subf %95, %102 : vector<1x128xf32>
    %179 = math.absf %178 : vector<1x128xf32>
    %180 = arith.mulf %179, %5 : vector<1x128xf32>
    %cst_56 = arith.constant dense<0.000000e+00> : vector<1xf32>
    %181 = vector.multi_reduction <add>, %180, %cst_56 [1] : vector<1x128xf32> to vector<1xf32>
    %182 = vector.shape_cast %181 : vector<1xf32> to vector<1x1xf32>
    %cst_57 = arith.constant dense<0.000000e+00> : vector<1xf32>
    %183 = vector.multi_reduction <add>, %182, %cst_57 [0] : vector<1x1xf32> to vector<1xf32>
    %184 = vector.shape_cast %183 : vector<1xf32> to vector<1x1xf32>
    %185 = arith.mulf %184, %169 : vector<1x1xf32>
    %cst_58 = arith.constant dense<0.000000e+00> : vector<4xf32>
    %186 = vector.multi_reduction <add>, %161, %cst_58 [1] : vector<4x128xf32> to vector<4xf32>
    %187 = vector.shape_cast %186 : vector<4xf32> to vector<4x1xf32>
    %cst_59 = arith.constant dense<0.000000e+00> : vector<1xf32>
    %188 = vector.multi_reduction <add>, %187, %cst_59 [0] : vector<4x1xf32> to vector<1xf32>
    %189 = vector.shape_cast %188 : vector<1xf32> to vector<1x1xf32>
    %190 = arith.mulf %189, %169 : vector<1x1xf32>
    %191 = tpu.iota {dimensions = array<i32: 1>} : vector<1x128xi32>
    %c0_i32 = arith.constant 0 : i32
    %192 = vector.broadcast %c0_i32 : i32 to vector<1x128xi32>
    %193 = arith.cmpi eq, %191, %192 : vector<1x128xi32>
    %cst_60 = arith.constant 0.000000e+00 : f32
    %194 = vector.shape_cast %41 : vector<1x1xf32> to vector<1x1xf32>
    %195 = vector.broadcast %194 : vector<1x1xf32> to vector<1x128xf32>
    %196 = vector.broadcast %cst_60 : f32 to vector<1x128xf32>
    %197 = arith.select %193, %195, %196 : vector<1x128xi1>, vector<1x128xf32>
    %c1_i32 = arith.constant 1 : i32
    %198 = vector.broadcast %c1_i32 : i32 to vector<1x128xi32>
    %199 = arith.cmpi eq, %191, %198 : vector<1x128xi32>
    %cst_61 = arith.constant 0.000000e+00 : f32
    %200 = vector.shape_cast %68 : vector<1x1xf32> to vector<1x1xf32>
    %201 = vector.broadcast %200 : vector<1x1xf32> to vector<1x128xf32>
    %202 = vector.broadcast %cst_61 : f32 to vector<1x128xf32>
    %203 = arith.select %199, %201, %202 : vector<1x128xi1>, vector<1x128xf32>
    %204 = arith.addf %197, %203 : vector<1x128xf32>
    %c2_i32 = arith.constant 2 : i32
    %205 = vector.broadcast %c2_i32 : i32 to vector<1x128xi32>
    %206 = arith.cmpi eq, %191, %205 : vector<1x128xi32>
    %cst_62 = arith.constant 0.000000e+00 : f32
    %207 = vector.shape_cast %93 : vector<1x1xf32> to vector<1x1xf32>
    %208 = vector.broadcast %207 : vector<1x1xf32> to vector<1x128xf32>
    %209 = vector.broadcast %cst_62 : f32 to vector<1x128xf32>
    %210 = arith.select %206, %208, %209 : vector<1x128xi1>, vector<1x128xf32>
    %211 = arith.addf %204, %210 : vector<1x128xf32>
    %c3_i32 = arith.constant 3 : i32
    %212 = vector.broadcast %c3_i32 : i32 to vector<1x128xi32>
    %213 = arith.cmpi eq, %191, %212 : vector<1x128xi32>
    %cst_63 = arith.constant 0.000000e+00 : f32
    %214 = vector.shape_cast %177 : vector<1x1xf32> to vector<1x1xf32>
    %215 = vector.broadcast %214 : vector<1x1xf32> to vector<1x128xf32>
    %216 = vector.broadcast %cst_63 : f32 to vector<1x128xf32>
    %217 = arith.select %213, %215, %216 : vector<1x128xi1>, vector<1x128xf32>
    %218 = arith.addf %211, %217 : vector<1x128xf32>
    %c4_i32 = arith.constant 4 : i32
    %219 = vector.broadcast %c4_i32 : i32 to vector<1x128xi32>
    %220 = arith.cmpi eq, %191, %219 : vector<1x128xi32>
    %cst_64 = arith.constant 0.000000e+00 : f32
    %221 = vector.shape_cast %185 : vector<1x1xf32> to vector<1x1xf32>
    %222 = vector.broadcast %221 : vector<1x1xf32> to vector<1x128xf32>
    %223 = vector.broadcast %cst_64 : f32 to vector<1x128xf32>
    %224 = arith.select %220, %222, %223 : vector<1x128xi1>, vector<1x128xf32>
    %225 = arith.addf %218, %224 : vector<1x128xf32>
    %c5_i32 = arith.constant 5 : i32
    %226 = vector.broadcast %c5_i32 : i32 to vector<1x128xi32>
    %227 = arith.cmpi eq, %191, %226 : vector<1x128xi32>
    %cst_65 = arith.constant 0.000000e+00 : f32
    %228 = vector.shape_cast %190 : vector<1x1xf32> to vector<1x1xf32>
    %229 = vector.broadcast %228 : vector<1x1xf32> to vector<1x128xf32>
    %230 = vector.broadcast %cst_65 : f32 to vector<1x128xf32>
    %231 = arith.select %227, %229, %230 : vector<1x128xi1>, vector<1x128xf32>
    %232 = arith.addf %225, %231 : vector<1x128xf32>
    %c0_66 = arith.constant 0 : index
    %c0_67 = arith.constant 0 : index
    %233 = vector.load %arg4[%c0_66, %c0_67] : memref<1x128xf32, #tpu.memory_space<vmem>>, vector<1x128xf32>
    tpu.vector_store %arg4[%c0_66, %c0_67], %232 {strides = array<i32>} : memref<1x128xf32, #tpu.memory_space<vmem>>, vector<1x128xf32>,
    return
  }
}

</mosaic_0001>

<bundles_post_ra>
// kernel: _criterion_device.1
= control target key start
LH: loop header
LB: loop body
LE: loop exit
PB: predicated region body
PF: predicated region fallthrough
CT: control target
= control target key end

     0   :  { %v1027_v0 = vmov 0   ;;  %v1028_v7 = vmov 0.0|0.0   ;;  %vm1029_vm0 = vmmov 0   ;;  %v1030_v18 = vmov 0.0   ;;  %s1427_s3 = inlined_call_operand.vmem [shape: s32[128,1], index: 3, kind: input, shape index: {}]   ;;  %s1428_s2 = inlined_call_operand.vmem [shape: f32[12,128], index: 2, kind: input, shape index: {}]   ;;  %s1429_s1 = inlined_call_operand.vmem [shape: f32[7,16], index: 1, kind: input, shape index: {}]   ;;  %s1430_s0 = inlined_call_operand.vmem [shape: f32[4,16], index: 0, kind: input, shape index: {}]   ;;  %s1431_s4 = inlined_call_operand.vmem [shape: f32[1,128], index: 4, kind: output, shape index: {}]  }
   0x1   :  { %1010 = vset.pattern.permute.xlu1 %v1027_v0  ;;  %1009 = vset.pattern.permute.xlu0 %v1027_v0  ;;  %v23_v1 = vld [vmem:[%s1427_s3 + $0x10] sm:$0xff]  ;;  %v21_v2 = vld [vmem:[%s1427_s3] sm:$0xff]  ;;  %v24_v3 = vld [vmem:[%s1427_s3 + $0x18] sm:$0xff]  ;;  %v37_v19 = vlaneseq  ;;  %vm1432_vm2 = vcmask 1046531   ;;  %vm1433_vm4 = vcmask 130048  }
   0x2   :  { %46 = vperm.xlu1 %1010, %v23_v1   ;;  %40 = vperm.xlu0 %1009, %v21_v2   ;;  %v22_v4 = vld [vmem:[%s1427_s3 + $0x8] sm:$0xff]  ;;  %v25_v6 = vld [vmem:[%s1427_s3 + $0x20] sm:$0xff]  ;;  %v28_v8 = vld [vmem:[%s1427_s3 + $0x38] sm:$0xff]  ;;  %v1031_v37 = vmov 1.0|1.0  }
   0x3   :  { %v26_v5 = vld [vmem:[%s1427_s3 + $0x28] sm:$0xff]  ;;  %924 = vmatprep.subr.bf16.mxu1 %v1028_v7  ;;  %972 = vmatprep.subr.bf16.mxu0 %v1028_v7  ;;  %v27_v9 = vld [vmem:[%s1427_s3 + $0x30] sm:$0xff]  ;;  %v29_v11 = vld [vmem:[%s1427_s3 + $0x40] sm:$0xff]  ;;  %v1111_v20 = vshrl.u32 %v37_v19, 7  ;;  %v1133_v27 = vand.u32 127, %v37_v19 }
   0x4   :  { %v30_v10 = vld [vmem:[%s1427_s3 + $0x48] sm:$0xff]  ;;  %v32_v12 = vld [vmem:[%s1427_s3 + $0x58] sm:$0xff]  ;;  %v31_v13 = vld [vmem:[%s1427_s3 + $0x50] sm:$0xff]  ;;  %851 = vmatprep.mubr.msk.f32.mxu1 %vm1029_vm0, %v1030_v18  ;;  %921 = vmatprep.mubr.msk.f32.mxu0 %vm1029_vm0, %v1030_v18 }
   0x5   :  { %v34_v14 = vld [vmem:[%s1427_s3 + $0x68] sm:$0xff]  ;;  %v33_v15 = vld [vmem:[%s1427_s3 + $0x60] sm:$0xff]  ;;  %v36_v16 = vld [vmem:[%s1427_s3 + $0x78] sm:$0xff]  ;;  %v1114_v21 = vsub.s32 3, %v1111_v20 }
   0x6   :  { %49 = vperm.xlu1 %1010, %v24_v3   ;;  %43 = vperm.xlu0 %1009, %v22_v4   ;;  %v35_v17 = vld [vmem:[%s1427_s3 + $0x70] sm:$0xff]  ;;  %v1119_v22 = vld [vmem:[%s1428_s2 + $0x8] sm:$0xf]  ;;  %v1124_v23 = vld [vmem:[%s1428_s2] sm:$0xff] }
   0x7   :  { %v512_v24 = vrot.slane %v1119_v22, %v1114_v21  ;;  %vm508_vm1 = vcmp.ge.f32.partialorder %v1124_v23, 0.0  ;;  %vm1143_vm8 = vmpackc.low %vm1433_vm4, %vm1433_vm4  ;;  %v1253_v1 = vrot.slane %v1119_v22, 3 }
   0x9   :  { %v1129_v25 = vsel %vm508_vm1, %v512_v24, 0.0  ;;  %v138_v3 = vmul.f32 %v1253_v1, %v1124_v23 }
   0xa   :  { %55 = vperm.xlu1 %1010, %v26_v5   ;;  %52 = vperm.xlu0 %1009, %v25_v6   ;;  %v515_v26 = vsel %vm1432_vm2, %v1129_v25, 0.0 }
   0xe   :  { %61 = vperm.xlu1 %1010, %v28_v8   ;;  %58 = vperm.xlu0 %1009, %v27_v9   ;;  %v530_v8 = vrot.slane %v1129_v25, 3 }
  0x12   :  { %67 = vperm.xlu1 %1010, %v30_v10   ;;  %64 = vperm.xlu0 %1009, %v29_v11  }
  0x16   :  { %73 = vperm.xlu1 %1010, %v32_v12   ;;  %70 = vperm.xlu0 %1009, %v31_v13  }
  0x1a   :  { %79 = vperm.xlu1 %1010, %v34_v14   ;;  %76 = vperm.xlu0 %1009, %v33_v15  }
  0x1e   :  { %85 = vperm.xlu1 %1010, %v36_v16   ;;  %82 = vperm.xlu0 %1009, %v35_v17  }
  0x3d   :  { %516 = vadd.xlane.f32.xlu0 %v515_v26 }
  0x81   :  { %v47_v28 = vpop.permute.xlu1 %46  ;;  %v41_v29 = vpop.permute.xlu0 %40 }
  0x82   :  { %vm87_vm3 = vcmp.eq.s32.totalorder %v1133_v27, %v41_v29  ;;  %vm89_vm6 = vcmp.eq.s32.totalorder %v1133_v27, %v47_v28 }
  0x83   :  { %v701_v32 = vsel %vm87_vm3, 1.0, %v1030_v18  ;;  %v703_v41 = vsel %vm89_vm6, 1.0, %v1030_v18 }
  0x85   :  { %v50_v30 = vpop.permute.xlu1 %49  ;;  %v44_v31 = vpop.permute.xlu0 %43 }
  0x86   :  { %vm88_vm5 = vcmp.eq.s32.totalorder %v1133_v27, %v44_v31  ;;  %vm90_vm7 = vcmp.eq.s32.totalorder %v1133_v27, %v50_v30 }
  0x87   :  { %v702_v33 = vsel %vm88_vm5, 1.0, %v1030_v18  ;;  %vm1147_vm9 = vmpackc.low %vm88_vm5, %vm87_vm3  ;;  %v704_v42 = vsel %vm90_vm7, 1.0, %v1030_v18 }
  0x88   :  { %v973_v36 = vpack.c.bf16 %v702_v33, %v701_v32  ;;  %926 = vmatpush3.bf16.msk.msra.mxu1 %vm1147_vm9, %v1031_v37  ;;  %vm1154_vm10 = vmpackc.low %vm90_vm7, %vm89_vm6  ;;  %v977_v45 = vpack.c.bf16 %v704_v42, %v703_v41  ;;  %v18_v32 = vld [vmem:[%s1429_s1] sm:$0x7f] }
  0x89   :  { %v56_v38 = vpop.permute.xlu1 %55  ;;  %v53_v39 = vpop.permute.xlu0 %52  ;;  %927 = vmatprep.subr.bf16.mxu1 %v1028_v7 }
  0x8a   :  { %975 = vmatpush3.bf16.xpose.msk.msra.mxu0 %vm1143_vm8, %v973_v36  ;;  %vm92_vm11 = vcmp.eq.s32.totalorder %v1133_v27, %v56_v38  ;;  %vm91_vm12 = vcmp.eq.s32.totalorder %v1133_v27, %v53_v39 }
  0x8b   :  { %976 = vmatprep.subr.bf16.mxu0 %v1028_v7  ;;  %vm1174_vm13 = vmpackc.low %vm92_vm11, %vm91_vm12  ;;  %v706_v50 = vsel %vm92_vm11, 1.0, %v1030_v18  ;;  %v705_v51 = vsel %vm91_vm12, 1.0, %v1030_v18 }
  0x8c   :  { %929 = vmatpush3.bf16.msk.msra.mxu1 %vm1154_vm10, %v1031_v37  ;;  %v981_v54 = vpack.c.bf16 %v706_v50, %v705_v51  ;;  %v17_v51 = vld [vmem:[%s1430_s0] sm:$0xf] }
  0x8d   :  { %v62_v43 = vpop.permute.xlu1 %61  ;;  %v59_v44 = vpop.permute.xlu0 %58  ;;  %930 = vmatprep.subr.bf16.mxu1 %v1028_v7 }
  0x8e   :  { %vm94_vm14 = vcmp.eq.s32.totalorder %v1133_v27, %v62_v43  ;;  %vm93_vm15 = vcmp.eq.s32.totalorder %v1133_v27, %v59_v44 }
  0x8f   :  { %vm1191_vm1 = vmpackc.low %vm94_vm14, %vm93_vm15  ;;  %v708_v59 = vsel %vm94_vm14, 1.0, %v1030_v18  ;;  %v707_v60 = vsel %vm93_vm15, 1.0, %v1030_v18 }
  0x90   :  { %932 = vmatpush3.bf16.msk.msra.mxu1 %vm1174_vm13, %v1031_v37  ;;  %v985_v63 = vpack.c.bf16 %v708_v59, %v707_v60 }
  0x91   :  { %v68_v47 = vpop.permute.xlu1 %67  ;;  %v65_v48 = vpop.permute.xlu0 %64  ;;  %933 = vmatprep.subr.bf16.mxu1 %v1028_v7 }
  0x92   :  { %979 = vmatpush3.bf16.xpose.msk.msra.mxu0 %vm1143_vm8, %v977_v45  ;;  %vm96_vm3 = vcmp.eq.s32.totalorder %v1133_v27, %v68_v47  ;;  %vm95_vm5 = vcmp.eq.s32.totalorder %v1133_v27, %v65_v48 }
  0x93   :  { %980 = vmatprep.subr.bf16.mxu0 %v1028_v7  ;;  %vm1211_vm6 = vmpackc.low %vm96_vm3, %vm95_vm5  ;;  %v710_v4 = vsel %vm96_vm3, 1.0, %v1030_v18  ;;  %v709_v5 = vsel %vm95_vm5, 1.0, %v1030_v18  ;;  %vm521_vm3 = vcmask 1043456  }
  0x94   :  { %935 = vmatpush3.bf16.msk.msra.mxu1 %vm1191_vm1, %v1031_v37  ;;  %v989_v6 = vpack.c.bf16 %v710_v4, %v709_v5  ;;  %v532_v11 = vsel %vm521_vm3, %v530_v8, 0.0 }
  0x95   :  { %v74_v52 = vpop.permute.xlu1 %73  ;;  %v71_v53 = vpop.permute.xlu0 %70  ;;  %936 = vmatprep.subr.bf16.mxu1 %v1028_v7  ;;  %v533_v13 = vrot.slane %v532_v11, 4 }
  0x96   :  { %vm98_vm7 = vcmp.eq.s32.totalorder %v1133_v27, %v74_v52  ;;  %vm1434_vm11 = vcmp.eq.s32.totalorder %v1133_v27, %v71_v53 }
  0x97   :  { %vm1228_vm12 = vmpackc.low %vm98_vm7, %vm1434_vm11  ;;  %v712_v9 = vsel %vm98_vm7, 1.0, %v1030_v18  ;;  %v534_v16 = vadd.f32 %v533_v13, %v532_v11 }
  0x98   :  { %938 = vmatpush3.bf16.msk.msra.mxu1 %vm1211_vm6, %v1031_v37 }
  0x99   :  { %v80_v56 = vpop.permute.xlu1 %79  ;;  %v77_v57 = vpop.permute.xlu0 %76  ;;  %939 = vmatprep.subr.bf16.mxu1 %v1028_v7  ;;  %v535_v19 = vrot.slane %v534_v16, 2 }
  0x9a   :  { %983 = vmatpush3.bf16.xpose.msk.msra.mxu0 %vm1143_vm8, %v981_v54  ;;  %vm100_vm2 = vcmp.eq.s32.totalorder %v1133_v27, %v80_v56  ;;  %vm1435_vm4 = vcmp.eq.s32.totalorder %v1133_v27, %v77_v57 }
  0x9b   :  { %984 = vmatprep.subr.bf16.mxu0 %v1028_v7  ;;  %vm1248_vm14 = vmpackc.low %vm100_vm2, %vm1435_vm4  ;;  %v714_v14 = vsel %vm100_vm2, 1.0, %v1030_v18  ;;  %v536_v28 = vadd.f32 %v535_v19, %v534_v16  ;;  %vm1456_vm2 = vcmask 130048  }
  0x9c   :  { %941 = vmatpush3.bf16.msk.msra.mxu1 %vm1228_vm12, %v1031_v37 }
  0x9d   :  { %v86_v61 = vpop.permute.xlu1 %85  ;;  %v83_v62 = vpop.permute.xlu0 %82  ;;  %942 = vmatprep.subr.bf16.mxu1 %v1028_v7  ;;  %v537_v30 = vrot.slane %v536_v28, 1 }
  0x9e   :  { %vm102_vm15 = vcmp.eq.s32.totalorder %v1133_v27, %v86_v61  ;;  %vm101_vm11 = vcmp.eq.s32.totalorder %v1133_v27, %v83_v62  ;;  %v424_v62 = vcvt.s32.f32 %v1111_v20 }
  0x9f   :  { %vm1268_vm4 = vmpackc.low %vm102_vm15, %vm101_vm11  ;;  %v716_v24 = vsel %vm102_vm15, 1.0, %v1030_v18  ;;  %v715_v26 = vsel %vm101_vm11, 1.0, %v1030_v18  ;;  %v538_v31 = vadd.f32 %v537_v30, %v536_v28 }
  0xa0   :  { %944 = vmatpush3.bf16.msk.msra.mxu1 %vm1248_vm14, %v1031_v37  ;;  %v1001_v29 = vpack.c.bf16 %v716_v24, %v715_v26 }
  0xa1   :  { %945 = vmatprep.subr.bf16.mxu1 %v1028_v7  ;;  %v539_v33 = vmax.f32 %v538_v31, 1.0 }
  0xa2   :  { %987 = vmatpush3.bf16.xpose.msk.msra.mxu0 %vm1143_vm8, %v985_v63 }
  0xa3   :  { %988 = vmatprep.subr.bf16.mxu0 %v1028_v7  ;;  %1011 = vrcp.f32 %v539_v33 }
  0xa4   :  { %947 = vmatpush3.bf16.msk.msra.mxu1 %vm1268_vm4, %v1031_v37 }
  0xa5   :  { %948 = vmatprep.subr.bf16.mxu1 %v1028_v7 }
  0xa7   :  { %852 = vmatmul.mubr.f32.vlgmr.msra.gmra.mrb[0].mxu1 %v138_v3  ;;  %v427_v3 = vsub.s32 0, %v1111_v20 }
  0xa8   :  { %950 = vmatpush3.bf16.msk.msra.mxu1 %vm1147_vm9, %v1031_v37  ;;  %886 = vmatprep.mubr.msk.f32.mxu1 %vm1029_vm0, %v1030_v18  ;;  %vm1454_vm9 = vcmp.eq.s32.totalorder %v1133_v27, %v71_v53  ;;  %vm1455_vm0 = vcmp.eq.s32.totalorder %v1133_v27, %v77_v57 }
  0xa9   :  { %951 = vmatprep.subr.bf16.mxu1 %v1028_v7  ;;  %v711_v10 = vsel %vm1454_vm9, 1.0, %v1030_v18  ;;  %v713_v15 = vsel %vm1455_vm0, 1.0, %v1030_v18  ;;  %vm641_vm9 = vcmask 1041409   ;;  %vm629_vm0 = vcmask 1040384  }
  0xaa   :  { %991 = vmatpush3.bf16.xpose.msk.msra.mxu0 %vm1143_vm8, %v989_v6  ;;  %v993_v12 = vpack.c.bf16 %v712_v9, %v711_v10  ;;  %v997_v17 = vpack.c.bf16 %v714_v14, %v713_v15 }
  0xab   :  { %992 = vmatprep.subr.bf16.mxu0 %v1028_v7 }
  0xac   :  { %953 = vmatpush3.bf16.msk.msra.mxu1 %vm1154_vm10, %v1031_v37  ;;  %vm542_vm10 = vcmp.gt.f32.partialorder %v538_v31, 0.0 }
  0xad   :  { %954 = vmatprep.subr.bf16.mxu1 %v1028_v7  ;;  %v1012_v41 = vpop.eup %1011 }
  0xb0   :  { %956 = vmatpush3.bf16.msk.msra.mxu1 %vm1174_vm13, %v1031_v37  ;;  %vm615_vm13 = vcmask 1043459  }
  0xb1   :  { %957 = vmatprep.subr.bf16.mxu1 %v1028_v7  ;;  %v616_v50 = vsel %vm615_vm13, %v1119_v22, 0.0  ;;  %vm1458_vm13 = vcmask 1046531  }
  0xb2   :  { %995 = vmatpush3.bf16.xpose.msk.msra.mxu0 %vm1143_vm8, %v993_v12  ;;  %617 = vadd.xlane.f32.xlu0 %v616_v50 }
  0xb3   :  { %996 = vmatprep.subr.bf16.mxu0 %v1028_v7 }
  0xb4   :  { %959 = vmatpush3.bf16.msk.msra.mxu1 %vm1191_vm1, %v1031_v37  ;;  %vm401_vm1 = vcmask 125952  }
  0xb5   :  { %960 = vmatprep.subr.bf16.mxu1 %v1028_v7  ;;  %v402_v52 = vsel %vm401_vm1, %v17_v51, -inf }
  0xb6   :  { %v403_v53 = vrot.slane %v402_v52, 4 }
  0xb8   :  { %962 = vmatpush3.bf16.msk.msra.mxu1 %vm1211_vm6, %v1031_v37  ;;  %v404_v54 = vmax.f32 %v402_v52, %v403_v53 }
  0xb9   :  { %963 = vmatprep.subr.bf16.mxu1 %v1028_v7 }
  0xba   :  { %999 = vmatpush3.bf16.xpose.msk.msra.mxu0 %vm1143_vm8, %v997_v17  ;;  %v405_v55 = vrot.slane %v404_v54, 2 }
  0xbb   :  { %1000 = vmatprep.subr.bf16.mxu0 %v1028_v7 }
  0xbc   :  { %965 = vmatpush3.bf16.msk.msra.mxu1 %vm1228_vm12, %v1031_v37  ;;  %v406_v56 = vmax.f32 %v404_v54, %v405_v55 }
  0xbd   :  { %966 = vmatprep.subr.bf16.mxu1 %v1028_v7 }
  0xbe   :  { %v407_v57 = vrot.slane %v406_v56, 1 }
  0xc0   :  { %968 = vmatpush3.bf16.msk.msra.mxu1 %vm1248_vm14, %v1031_v37  ;;  %v1362_v58 = vmax.f32 %v406_v56, %v407_v57 }
  0xc1   :  { %969 = vmatprep.subr.bf16.mxu1 %v1028_v7 }
  0xc2   :  { %1003 = vmatpush3.bf16.xpose.msk.msra.mxu0 %vm1143_vm8, %v1001_v29  ;;  %v409_v59 = vsub.f32 %v17_v51, %v1362_v58  ;;  %vm446_vm5 = vcmp.eq.f32.partialorder %v17_v51, %v1362_v58 }
  0xc3   :  { %v447_v0 = vsel %vm446_vm5, %v424_v62, 4.0  ;;  %vm663_vm5 = vcmp.eq.s32.totalorder %v1133_v27, 0 }
  0xc4   :  { %971 = vmatpush3.bf16.msk.msra.mxu1 %vm1268_vm4, %v1031_v37  ;;  %v410_v60 = vmul.f32 1.442695, %v409_v59  ;;  %v448_v4 = vsel %vm401_vm1, %v447_v0, inf }
  0xc5   :  { %v449_v6 = vrot.slane %v448_v4, 4 }
  0xc7   :  { %887 = vmatmul.mubr.f32.vlgmr.msra.gmra.mrb[2].mxu1 %v1253_v1  ;;  %v450_v12 = vmin.f32 %v448_v4, %v449_v6 }
  0xc9   :  { %922 = vmatmul.mubr.msk.f32.vlgmr.msra.gmra.mrb[0].mxu0 %vm1456_vm2, %v18_v32  ;;  %v451_v15 = vrot.slane %v450_v12, 2  ;;  %v476_v32 = vmul.u32 8, %v1111_v20  ;;  %vm484_vm2 = vcmask 123904  }
  0xca   :  { %v517_v35 = vpop.xlane.xlu0 %516 }
  0xcb   :  { %v519_v36 = vrot.slane %v517_v35, 3  ;;  %v452_v19 = vmin.f32 %v450_v12, %v451_v15  ;;  %vm477_vm7 = vcmp.ge.s32.totalorder %v1133_v27, %v476_v32  ;;  %v574_v12 = vsub.s32 2, %v1111_v20 }
  0xcd   :  { %v522_v34 = vsel %vm521_vm3, %v519_v36, 0.0  ;;  %v453_v28 = vrot.slane %v452_v19, 1  ;;  %v478_v36 = vadd.s32 8, %v476_v32 }
  0xce   :  { %v523_v7 = vrot.slane %v522_v34, 4 }
  0xcf   :  { %v454_v31 = vmin.f32 %v452_v19, %v453_v28  ;;  %vm479_vm11 = vcmp.lt.s32.totalorder %v1133_v27, %v478_v36 }
  0xd0   :  { %v524_v38 = vadd.f32 %v523_v7, %v522_v34  ;;  %vm480_vm15 = vmand %vm477_vm7, %vm479_vm11  ;;  %vm671_vm7 = vcmp.eq.s32.totalorder %v1133_v27, 3  ;;  %vm679_vm11 = vcmp.eq.s32.totalorder %v1133_v27, 4 }
  0xd1   :  { %vm473_vm14 = vcmp.gt.f32.partialorder %v454_v31, 0.5 }
  0xd2   :  { %v525_v39 = vrot.slane %v524_v38, 2  ;;  %v766_v50 = vsel %vm473_vm14, 1.0, %v1030_v18 }
  0xd4   :  { %v526_v40 = vadd.f32 %v525_v39, %v524_v38 }
  0xd6   :  { %v527_v37 = vrot.slane %v526_v40, 1 }
  0xd8   :  { %v528_v42 = vadd.f32 %v527_v37, %v526_v40  ;;  %v624_v40 = vrot.slane %v1124_v23, 1  ;;  %v638_v37 = vrot.slane %v1119_v22, 2 }
  0xda   :  { %v541_v43 = vmul.f32 %v1012_v41, %v528_v42 }
  0xdc   :  { %1013 = vrsqrt.f32 %v541_v43  ;;  %vm545_vm4 = vcmp.eq.f32.partialorder %v541_v43, inf  ;;  %v548_v45 = vand.u32 2147483648, %v541_v43  ;;  %vm547_vm8 = vcmp.eq.f32.partialorder %v541_v43, 0.0 }
  0xdd   :  { %1015 = vpow2.f32 %v410_v60 }
  0xe6   :  { %v1014_v44 = vpop.eup %1013 }
  0xe7   :  { %v544_v46 = vmul.f32 %v1014_v44, %v541_v43  ;;  %v1016_v61 = vpop.eup %1015 }
  0xe8   :  { %v412_v63 = vsel %vm401_vm1, %v1016_v61, 0.0 }
  0xe9   :  { %v546_v47 = vsel %vm545_vm4, %v541_v43, %v544_v46  ;;  %v413_v2 = vrot.slane %v412_v63, 4  ;;  %vm556_vm4 = vcmp.gt.f32.partialorder %v1129_v25, 0.0 }
  0xea   :  { %v549_v48 = vsel %vm547_vm8, %v548_v45, %v546_v47  ;;  %vm459_vm8 = vcmask 122880  }
  0xeb   :  { %v1354_v49 = vsel %vm542_vm10, %v549_v48, 0.0  ;;  %v414_v8 = vadd.f32 %v413_v2, %v412_v63  ;;  %vm1457_vm10 = vcmask 130048  }
  0xec   :  { %551 = vmax.xlane.f32.xlu1 %v1354_v49 }
  0xed   :  { %v415_v13 = vrot.slane %v414_v8, 2 }
  0xef   :  { %v416_v16 = vadd.f32 %v415_v13, %v414_v8  ;;  %v591_v8 = vsub.s32 6, %v1111_v20 }
  0xf1   :  { %v417_v24 = vrot.slane %v416_v16, 1 }
  0xf3   :  { %v418_v29 = vadd.f32 %v417_v24, %v416_v16 }
  0xf5   :  { %1017 = vlog2.f32 %v418_v29 }
  0xff   :  { %v1018_v39 = vpop.eup %1017 }
 0x100   :  { %v420_v43 = vmul.f32 0.6931472, %v1018_v39 }
 0x102   :  { %v421_v57 = vadd.f32 %v420_v43, %v1362_v58 }
 0x17a   :  { %v205_v5 = vpop.f32.mrb[0].mxu1 }
 0x17b   :  { %v428_v9 = vrot.slane %v205_v5, %v427_v3  ;;  %v853_v10 = vpop.f32.mrb[1].mxu1  ;;  %v455_v35 = vsub.f32 %v454_v31, %v205_v5 }
 0x17d   :  { %v429_v11 = vsub.f32 %v424_v62, %v428_v9  ;;  %v456_v7 = vand.u32 2147483647, %v455_v35 }
 0x17f   :  { %v430_v14 = vand.u32 2147483647, %v429_v11  ;;  %vm457_vm12 = vcmp.lt.f32.partialorder %v456_v7, 0.5  ;;  %v552_v11 = vpop.xlane.xlu1 %551 }
 0x180   :  { %v553_v15 = vmax.f32 %v552_v11, 1e-12 }
 0x181   :  { %vm431_vm6 = vcmp.lt.f32.partialorder %v430_v14, 0.5  ;;  %v580_v14 = vsub.s32 4, %v1111_v20 }
 0x182   :  { %v432_v17 = vsel %vm431_vm6, %v17_v51, 0.0  ;;  %v767_v51 = vsel %vm480_vm15, 1.0, %v1030_v18  ;;  %vm668_vm6 = vcmp.eq.s32.totalorder %v1133_v27, 2 }
 0x183   :  { %v433_v26 = vsel %vm401_vm1, %v432_v17, 0.0  ;;  %v483_v56 = vmul.f32 %v767_v51, %v766_v50  ;;  %vm499_vm1 = vcmask 1041408  }
 0x184   :  { %v434_v30 = vrot.slane %v433_v26, 4 }
 0x185   :  { %v485_v5 = vsel %vm484_vm2, %v483_v56, 0.0 }
 0x186   :  { %v435_v33 = vadd.f32 %v434_v30, %v433_v26  ;;  %v586_v30 = vsub.s32 5, %v1111_v20 }
 0x188   :  { %v436_v34 = vrot.slane %v435_v33, 2 }
 0x18a   :  { %v437_v38 = vadd.f32 %v436_v34, %v435_v33 }
 0x18c   :  { %v438_v44 = vrot.slane %v437_v38, 1 }
 0x18e   :  { %v439_v59 = vadd.f32 %v438_v44, %v437_v38 }
 0x19a   :  { %v275_v41 = vpop.f32.mrb[2].mxu1 }
 0x19b   :  { %v458_v45 = vsel %vm457_vm12, %v275_v41, 0.0  ;;  %v888_v46 = vpop.f32.mrb[3].mxu1  ;;  %v491_v60 = vrot.slane %v275_v41, %v427_v3  ;;  %v440_v3 = vsub.f32 %v421_v57, %v439_v59  ;;  %vm690_vm12 = vcmp.eq.s32.totalorder %v1133_v27, 5 }
 0x19c   :  { %v1376_v42 = vpop.f32.mrb[0].mxu0  ;;  %v464_v16 = vsel %vm459_vm8, %v458_v45, 0.0 }
 0x19d   :  { %v923_v47 = vpop.f32.mrb[1].mxu0  ;;  %v626_v48 = vsub.f32 %v1376_v42, %v624_v40  ;;  %v560_v52 = vrot.slane %v1376_v42, %v1114_v21  ;;  %v492_v6 = vmul.f32 %v767_v51, %v491_v60  ;;  %v441_v9 = vsel %vm1457_vm10, %v440_v3, 0.0 }
 0x19e   :  { %v592_v13 = vrot.slane %v1376_v42, %v591_v8  ;;  %v575_v17 = vrot.slane %v1376_v42, %v574_v12  ;;  %v581_v29 = vrot.slane %v1376_v42, %v580_v14  ;;  %v603_v31 = vrot.slane %v1376_v42, 3 }
 0x19f   :  { %v627_v53 = vand.u32 2147483647, %v626_v48  ;;  %v561_v54 = vsub.f32 %v1124_v23, %v560_v52  ;;  %v562_v55 = vsub.f32 %v1119_v22, %v560_v52  ;;  %v493_v10 = vsel %vm484_vm2, %v492_v6, 0.0 }
 0x1a0   :  { %v593_v24 = vmul.f32 %v592_v13, %v1124_v23  ;;  %v594_v26 = vmul.f32 %v592_v13, %v1119_v22  ;;  %v587_v7 = vrot.slane %v1376_v42, %v586_v30  ;;  %v605_v38 = vmul.f32 %v603_v31, %v1376_v42  ;;  %v618_v42 = vpop.xlane.xlu0 %617 }
 0x1a1   :  { %v640_v61 = vmul.f32 %v638_v37, %v627_v53  ;;  %v628_v18 = vmul.f32 %v627_v53, %v1253_v1  ;;  %v565_v62 = vrot.slane %v561_v54, 4  ;;  %v566_v63 = vrot.slane %v562_v55, 4 }
 0x1a2   :  { %v460_v1 = vsel %vm459_vm8, %v275_v41, 0.0  ;;  %v597_v35 = vrot.slane %v593_v24, 4  ;;  %v598_v36 = vrot.slane %v594_v26, 4  ;;  %v609_v37 = vrot.slane %v605_v38, %v1114_v21 }
 0x1a3   :  { %v642_v0 = vsel %vm641_vm9, %v640_v61, 0.0  ;;  %v630_v2 = vsel %vm629_vm0, %v628_v18, 0.0  ;;  %v567_v4 = vsel %vm521_vm3, %v565_v62, %v566_v63  ;;  %v620_v50 = vmax.f32 %v618_v42, 1.0 }
 0x1a4   :  { %643 = vadd.xlane.f32.xlu1 %v642_v0  ;;  %631 = vadd.xlane.f32.xlu0 %v630_v2  ;;  %v569_v58 = vsel %vm556_vm4, %v567_v4, 1.0  ;;  %v599_v22 = vsel %vm521_vm3, %v597_v35, %v598_v36 }
 0x1a5   :  { %1019 = vrcp.f32 %v569_v58 }
 0x1a6   :  { %1021 = vrcp.f32 %v553_v15 }
 0x1a7   :  { %1023 = vrcp.f32 %v620_v50 }
 0x1a8   :  { %486 = vadd.xlane.f32.xlu1 %v485_v5  ;;  %461 = vadd.xlane.f32.xlu0 %v460_v1 }
 0x1ac   :  { %442 = vadd.xlane.f32.xlu1 %v441_v9  ;;  %494 = vadd.xlane.f32.xlu0 %v493_v10 }
 0x1af   :  { %v1020_v19 = vpop.eup %1019 }
 0x1b0   :  { %v576_v28 = vmul.f32 %v1020_v19, %v575_v17  ;;  %465 = vadd.xlane.f32.xlu0 %v464_v16  ;;  %v582_v33 = vmul.f32 %v1020_v19, %v581_v29  ;;  %v1022_v41 = vpop.eup %1021 }
 0x1b1   :  { %v555_v44 = vmul.f32 %v1022_v41, %v1354_v49  ;;  %v1024_v51 = vpop.eup %1023 }
 0x1b2   :  { %v577_v32 = vmul.f32 %v1020_v19, %v576_v28  ;;  %v646_v52 = vrot.slane %v1024_v51, 2  ;;  %v635_v21 = vrot.slane %v1024_v51, 3 }
 0x1b4   :  { %v583_v34 = vadd.f32 %v582_v33, %v577_v32 }
 0x1b6   :  { %v588_v39 = vadd.f32 %v587_v7, %v583_v34 }
 0x1b8   :  { %v601_v40 = vadd.f32 %v599_v22, %v588_v39 }
 0x1ba   :  { %v610_v20 = vsub.f32 %v601_v40, %v609_v37 }
 0x1bc   :  { %v611_v43 = vsub.f32 %v610_v20, %v1124_v23 }
 0x1be   :  { %v612_v45 = vand.u32 2147483647, %v611_v43 }
 0x1c0   :  { %v613_v46 = vmul.f32 %v612_v45, %v555_v44 }
 0x1c2   :  { %v614_v47 = vsel %vm556_vm4, %v613_v46, 0.0 }
 0x1c3   :  { %v649_v48 = vsel %vm1458_vm13, %v614_v47, 0.0 }
 0x1c4   :  { %650 = vadd.xlane.f32.xlu1 %v649_v48 }
 0x231   :  { %v644_v53 = vpop.xlane.xlu1 %643  ;;  %v632_v54 = vpop.xlane.xlu0 %631 }
 0x232   :  { %v648_v55 = vmul.f32 %v646_v52, %v644_v53  ;;  %v637_v23 = vmul.f32 %v635_v21, %v632_v54 }
 0x234   :  { %674 = vperm.xlu0 %1009, %v637_v23   ;;  %682 = vperm.xlu1 %1010, %v648_v55  }
 0x235   :  { %v462_v49 = vpop.xlane.xlu0 %461  ;;  %v487_v56 = vpop.xlane.xlu1 %486 }
 0x236   :  { %v469_v63 = vmax.f32 %v462_v49, 1.0 }
 0x238   :  { %1025 = vrcp.f32 %v469_v63 }
 0x239   :  { %v495_v57 = vpop.xlane.xlu0 %494  ;;  %v443_v25 = vpop.xlane.xlu1 %442 }
 0x23a   :  { %v496_v59 = vsub.f32 %v487_v56, %v495_v57  ;;  %v445_v14 = vmul.f32 0.0625, %v443_v25 }
 0x23c   :  { %v497_v60 = vand.u32 2147483647, %v496_v59  ;;  %v664_v19 = vsel %vm663_vm5, %v445_v14, 0.0 }
 0x23d   :  { %v466_v1 = vpop.xlane.xlu0 %465 }
 0x23e   :  { %v500_v62 = vsel %vm499_vm1, %v497_v60, 0.0  ;;  %v468_v9 = vmul.f32 100.0, %v466_v1 }
 0x23f   :  { %v501_v0 = vrot.slane %v500_v62, 4 }
 0x241   :  { %v502_v5 = vadd.f32 %v501_v0, %v500_v62 }
 0x242   :  { %v1026_v10 = vpop.eup %1025 }
 0x243   :  { %v503_v3 = vrot.slane %v502_v5, 2  ;;  %v471_v13 = vmul.f32 %v1026_v10, %v468_v9 }
 0x245   :  { %v504_v8 = vadd.f32 %v503_v3, %v502_v5  ;;  %v472_v16 = vsub.f32 100.0, %v471_v13 }
 0x247   :  { %v505_v12 = vrot.slane %v504_v8, 1 }
 0x249   :  { %v506_v17 = vadd.f32 %v505_v12, %v504_v8 }
 0x24b   :  { %v507_v28 = vmul.f32 0.5, %v506_v17 }
 0x24d   :  { %v669_v30 = vsel %vm668_vm6, %v507_v28, 0.0 }
 0x251   :  { %v651_v61 = vpop.xlane.xlu1 %650 }
 0x252   :  { %v653_v18 = vrot.slane %v651_v61, 3 }
 0x254   :  { %v655_v2 = vsel %vm521_vm3, %v653_v18, 0.0  ;;  %vm665_vm3 = vcmp.eq.s32.totalorder %v1133_v27, 1 }
 0x255   :  { %v656_v4 = vrot.slane %v655_v2, 4  ;;  %v666_v26 = vsel %vm665_vm3, %v472_v16, 0.0 }
 0x256   :  { %v667_v29 = vadd.f32 %v666_v26, %v664_v19 }
 0x257   :  { %v657_v58 = vadd.f32 %v656_v4, %v655_v2 }
 0x258   :  { %v670_v33 = vadd.f32 %v669_v30, %v667_v29 }
 0x259   :  { %v658_v6 = vrot.slane %v657_v58, 2 }
 0x25b   :  { %v659_v11 = vadd.f32 %v658_v6, %v657_v58 }
 0x25d   :  { %v660_v15 = vrot.slane %v659_v11, 1 }
 0x25f   :  { %v661_v24 = vadd.f32 %v660_v15, %v659_v11 }
 0x261   :  { %v662_v31 = vmul.f32 %v1024_v51, %v661_v24 }
 0x263   :  { %v691_v34 = vsel %vm690_vm12, %v662_v31, 0.0 }
 0x264   :  { %v693_v22 = vrot.slane %v691_v34, 3 }
 0x2b3   :  { %v675_v32 = vpop.permute.xlu0 %674  ;;  %v683_v35 = vpop.permute.xlu1 %682 }
 0x2b4   :  { %v677_v36 = vsel %vm671_vm7, %v675_v32, 0.0  ;;  %v685_v7 = vsel %vm679_vm11, %v683_v35, 0.0 }
 0x2b5   :  { %v678_v38 = vadd.f32 %v677_v36, %v670_v33  ;;  %v687_v39 = vrot.slane %v685_v7, 1 }
 0x2b7   :  { %v689_v40 = vadd.f32 %v687_v39, %v678_v38 }
 0x2b9   :  { %v695_v37 = vadd.f32 %v693_v22, %v689_v40 }
 0x2bb   :  { %696 = vst [vmem:[%s1431_s4] sm:$0x1] %v695_v37 }

</bundles_post_ra>
